<compile_context>
chip_gen: v5e
topology: v5e:2x2
jax: 0.10.0
libtpu: 0.0.40
codegen_flags: <defaults>
</compile_context>

<pallas_src>
import functools
import math

import jax
import jax.numpy as jnp
from jax.experimental import pallas as pl
from jax.experimental.pallas import tpu as pltpu


def _round_up(x, m):
    return (x + m - 1) // m * m


def projection_kernel(x_ref, w_ref, b_ref, o_ref, acc_ref):
    """One (bm, bn) tile of o = x @ W + b, accumulated over the K grid axis."""
    k = pl.program_id(2)

    @pl.when(k == 0)
    def _():
        acc_ref[...] = jnp.zeros_like(acc_ref)

    acc_ref[...] += jnp.dot(x_ref[...], w_ref[...],
                            preferred_element_type=jnp.float32)

    @pl.when(k == pl.num_programs(2) - 1)
    def _():
        o_ref[...] = (acc_ref[...] + b_ref[...]).astype(o_ref.dtype)


@functools.partial(jax.jit,
                   static_argnames=("block_m", "block_n", "block_k", "compute_dtype"))
def projection_layer(x, w, b, *, block_m=256, block_n=512, block_k=512,
                     compute_dtype=jnp.bfloat16):
    """x: (..., d_model); w: (d_model, vocab) (pre-transposed vs PyTorch); b: (vocab,)."""
    *lead, d_model = x.shape
    vocab = w.shape[1]
    m = math.prod(lead) if lead else 1

    # Pad to lane/sublane friendly sizes (zero padding is exact for a matmul + bias).
    k_pad = _round_up(d_model, 128)
    n_pad = _round_up(vocab, 128)
    bm = min(block_m, _round_up(m, 8))
    bn = min(block_n, n_pad)
    bk = min(block_k, k_pad)
    m_pad = _round_up(m, bm)
    n_pad = _round_up(n_pad, bn)
    k_pad = _round_up(k_pad, bk)

    x2d = jnp.pad(x.reshape(m, d_model).astype(compute_dtype),
                  ((0, m_pad - m), (0, k_pad - d_model)))
    w_p = jnp.pad(w.astype(compute_dtype),
                  ((0, k_pad - d_model), (0, n_pad - vocab)))
    b_p = jnp.pad(b.astype(jnp.float32), (0, n_pad - vocab)).reshape(1, n_pad)

    # VMEM budget: double-buffered x / W / bias / out tiles + f32 accumulator,
    # with 2x headroom, clamped to a range safe on v5e / v6e / v7x.
    cbytes = jnp.dtype(compute_dtype).itemsize
    obytes = jnp.dtype(x.dtype).itemsize
    tile_bytes = (2 * (bm * bk + bk * bn) * cbytes   # x and W tiles, double-buffered
                  + 2 * bn * 4                       # bias tile, double-buffered
                  + 2 * bm * bn * obytes             # output tile, double-buffered
                  + bm * bn * 4)                     # f32 accumulator scratch
    vmem_limit = int(min(max(2 * tile_bytes, 32 * 1024 * 1024), 64 * 1024 * 1024))

    grid = (m_pad // bm, n_pad // bn, k_pad // bk)
    out = pl.pallas_call(
        projection_kernel,
        out_shape=jax.ShapeDtypeStruct((m_pad, n_pad), x.dtype),
        grid_spec=pltpu.PrefetchScalarGridSpec(
            num_scalar_prefetch=0,
            grid=grid,
            in_specs=[
                pl.BlockSpec((bm, bk), lambda i, j, k: (i, k)),   # row tile of x
                pl.BlockSpec((bk, bn), lambda i, j, k: (k, j)),   # column tile of W
                pl.BlockSpec((1, bn), lambda i, j, k: (0, j)),    # bias slice (f32)
            ],
            out_specs=pl.BlockSpec((bm, bn), lambda i, j, k: (i, j)),
            scratch_shapes=[pltpu.VMEM((bm, bn), jnp.float32)],
        ),
        compiler_params=pltpu.CompilerParams(
            dimension_semantics=("parallel", "parallel", "arbitrary"),
            vmem_limit_bytes=vmem_limit,
        ),
    )(x2d, w_p, b_p)

    return out[:m, :vocab].reshape(*lead, vocab)


def init_params(key, d_model, vocab_size, dtype=jnp.float32):
    """Mimic nn.Linear(d_model, vocab_size) init: uniform(+/- 1/sqrt(d_model))."""
    kw, kb = jax.random.split(key)
    bound = 1.0 / math.sqrt(d_model)
    # Stored transposed relative to PyTorch's (out_features, in_features) convention.
    w = jax.random.uniform(kw, (d_model, vocab_size), dtype, -bound, bound)
    b = jax.random.uniform(kb, (vocab_size,), dtype, -bound, bound)
    return w, b


if __name__ == "__main__":
    batch, seq, d_model, vocab_size = 2, 8, 32, 50

    key = jax.random.PRNGKey(0)
    kx, kp = jax.random.split(key)
    x = jax.random.normal(kx, (batch, seq, d_model), jnp.float32)
    w, b = init_params(kp, d_model, vocab_size)

    ref = x @ w + b  # pure-JAX reference for the nn.Linear forward

    # f32 compute path: tight numerical check.
    out_f32 = jax.block_until_ready(projection_layer(x, w, b, compute_dtype=jnp.float32))
    assert out_f32.shape == (batch, seq, vocab_size)
    assert jnp.allclose(out_f32, ref, atol=1e-5, rtol=1e-5), "f32 mismatch vs reference"

    # bf16 operand path (full-rate MXU path for real shapes): loose check, f32 accumulation.
    out_bf16 = jax.block_until_ready(projection_layer(x, w, b, compute_dtype=jnp.bfloat16))
    assert out_bf16.shape == (batch, seq, vocab_size)
    assert jnp.allclose(out_bf16, ref, atol=5e-2, rtol=5e-2), "bf16 mismatch vs reference"

    print("KERNEL_OK")
</pallas_src>

<mosaic_0001>
module attributes {stable_mosaic.version = 11 : i64} {
  func.func @projection_kernel(%arg0: i32, %arg1: i32, %arg2: i32, %arg3: memref<16x128xf32, #tpu.memory_space<vmem>>, %arg4: memref<128x128xf32, #tpu.memory_space<vmem>>, %arg5: memref<1x128xf32, #tpu.memory_space<vmem>>, %arg6: memref<16x128xf32, #tpu.memory_space<vmem>>, %arg7: memref<16x128xf32, #tpu.memory_space<vmem>>) attributes {dimension_semantics = [#tpu.dimension_semantics<parallel>, #tpu.dimension_semantics<parallel>, #tpu.dimension_semantics<arbitrary>], iteration_bounds = array<i64: 1, 1, 1>, scalar_prefetch = 0 : i64, scratch_operands = 1 : i64, tpu.core_type = #tpu.core_type<tc>, window_params = [{transform_indices = @transform_0, window_bounds = array<i64: 16, 128>}, {transform_indices = @transform_1, window_bounds = array<i64: 128, 128>}, {transform_indices = @transform_2, window_bounds = array<i64: 1, 128>}, {transform_indices = @transform_3, window_bounds = array<i64: 16, 128>}]} {
    %c0_i32 = arith.constant 0 : i32
    %0 = arith.cmpi eq, %arg2, %c0_i32 : i32
    %1 = arith.extui %0 : i1 to i32
    %c0_i32_0 = arith.constant 0 : i32
    %2 = arith.cmpi ne, %1, %c0_i32_0 : i32
    scf.if %2 {
      %cst_10 = arith.constant 0.000000e+00 : f32
      %12 = vector.broadcast %cst_10 : f32 to vector<16x128xf32>
      %c0_11 = arith.constant 0 : index
      %c0_12 = arith.constant 0 : index
      %13 = vector.load %arg7[%c0_11, %c0_12] : memref<16x128xf32, #tpu.memory_space<vmem>>, vector<16x128xf32>
      tpu.vector_store %arg7[%c0_11, %c0_12], %12 {strides = array<i32>} : memref<16x128xf32, #tpu.memory_space<vmem>>, vector<16x128xf32>,
    } else {
    }
    %c0 = arith.constant 0 : index
    %c0_1 = arith.constant 0 : index
    %3 = vector.load %arg7[%c0, %c0_1] : memref<16x128xf32, #tpu.memory_space<vmem>>, vector<16x128xf32>
    %c0_2 = arith.constant 0 : index
    %c0_3 = arith.constant 0 : index
    %4 = vector.load %arg3[%c0_2, %c0_3] : memref<16x128xf32, #tpu.memory_space<vmem>>, vector<16x128xf32>
    %c0_4 = arith.constant 0 : index
    %c0_5 = arith.constant 0 : index
    %5 = vector.load %arg4[%c0_4, %c0_5] : memref<128x128xf32, #tpu.memory_space<vmem>>, vector<128x128xf32>
    %cst = arith.constant dense<0.000000e+00> : vector<16x128xf32>
    %6 = tpu.matmul %4, %5, %cst {dimension_numbers = #tpu.dot_dimension_numbers<[1], [0], [0], [1], [0, 0, 1, 1], [], []>} : vector<16x128xf32>, vector<128x128xf32>, vector<16x128xf32> -> vector<16x128xf32>
    %7 = arith.addf %3, %6 : vector<16x128xf32>
    %c0_6 = arith.constant 0 : index
    %c0_7 = arith.constant 0 : index
    %8 = vector.load %arg7[%c0_6, %c0_7] : memref<16x128xf32, #tpu.memory_space<vmem>>, vector<16x128xf32>
    tpu.vector_store %arg7[%c0_6, %c0_7], %7 {strides = array<i32>} : memref<16x128xf32, #tpu.memory_space<vmem>>, vector<16x128xf32>,
    %c0_i32_8 = arith.constant 0 : i32
    %9 = arith.cmpi eq, %arg2, %c0_i32_8 : i32
    %10 = arith.extui %9 : i1 to i32
    %c0_i32_9 = arith.constant 0 : i32
    %11 = arith.cmpi ne, %10, %c0_i32_9 : i32
    scf.if %11 {
      %c0_10 = arith.constant 0 : index
      %c0_11 = arith.constant 0 : index
      %12 = vector.load %arg7[%c0_10, %c0_11] : memref<16x128xf32, #tpu.memory_space<vmem>>, vector<16x128xf32>
      %c0_12 = arith.constant 0 : index
      %c0_13 = arith.constant 0 : index
      %13 = vector.load %arg5[%c0_12, %c0_13] : memref<1x128xf32, #tpu.memory_space<vmem>>, vector<1x128xf32>
      %14 = vector.broadcast %13 : vector<1x128xf32> to vector<16x128xf32>
      %15 = arith.addf %12, %14 : vector<16x128xf32>
      %c0_14 = arith.constant 0 : index
      %c0_15 = arith.constant 0 : index
      %16 = vector.load %arg6[%c0_14, %c0_15] : memref<16x128xf32, #tpu.memory_space<vmem>>, vector<16x128xf32>
      tpu.vector_store %arg6[%c0_14, %c0_15], %15 {strides = array<i32>} : memref<16x128xf32, #tpu.memory_space<vmem>>, vector<16x128xf32>,
    } else {
    }
    return
  }
  func.func @transform_0(%arg0: i32, %arg1: i32, %arg2: i32) -> (i32, i32) {
    %c0_i32 = arith.constant 0 : i32
    return %arg0, %arg2 : i32, i32
  }
  func.func @transform_1(%arg0: i32, %arg1: i32, %arg2: i32) -> (i32, i32) {
    %c0_i32 = arith.constant 0 : i32
    return %arg2, %arg1 : i32, i32
  }
  func.func @transform_2(%arg0: i32, %arg1: i32, %arg2: i32) -> (i32, i32) {
    %c0_i32 = arith.constant 0 : i32
    %c0_i32_0 = arith.constant 0 : i32
    return %c0_i32, %arg1 : i32, i32
  }
  func.func @transform_3(%arg0: i32, %arg1: i32, %arg2: i32) -> (i32, i32) {
    %c0_i32 = arith.constant 0 : i32
    return %arg0, %arg1 : i32, i32
  }
}

</mosaic_0001>

<bundles_post_ra>
// kernel: projection_layer.1
= control target key start
LH: loop header
LB: loop body
LE: loop exit
PB: predicated region body
PF: predicated region fallthrough
CT: control target
= control target key end

     0   :  { %s184_s1 = inlined_call_operand.vmem [shape: f32[128,128], index: 1, kind: input, shape index: {}]   ;;  %s185_s2 = inlined_call_operand.vmem [shape: f32[1,128], index: 2, kind: input, shape index: {}]   ;;  %s186_s0 = inlined_call_operand.vmem [shape: f32[16,128], index: 0, kind: input, shape index: {}]   ;;  %s187_s3 = inlined_call_operand.vmem [shape: f32[16,128], index: 3, kind: output, shape index: {}]  }
   0x1   :  { %v39_v0 = vld [vmem:[%s184_s1 + $0x78] sm:$0xff]  ;;  %v38_v1 = vld [vmem:[%s184_s1 + $0x70] sm:$0xff]  ;;  %v37_v2 = vld [vmem:[%s184_s1 + $0x68] sm:$0xff] }
   0x2   :  { %40 = vmatpush.msra.mxu0 %v39_v0  ;;  %84 = vmatpush.msra.mxu1 %v39_v0  ;;  %v36_v3 = vld [vmem:[%s184_s1 + $0x60] sm:$0xff]  ;;  %v35_v4 = vld [vmem:[%s184_s1 + $0x58] sm:$0xff]  ;;  %v34_v5 = vld [vmem:[%s184_s1 + $0x50] sm:$0xff] }
   0x3   :  { %v33_v6 = vld [vmem:[%s184_s1 + $0x48] sm:$0xff]  ;;  %v32_v7 = vld [vmem:[%s184_s1 + $0x40] sm:$0xff]  ;;  %v31_v8 = vld [vmem:[%s184_s1 + $0x38] sm:$0xff] }
   0x4   :  { %41 = vmatpush.msra.mxu0 %v38_v1  ;;  %85 = vmatpush.msra.mxu1 %v38_v1  ;;  %v30_v9 = vld [vmem:[%s184_s1 + $0x30] sm:$0xff]  ;;  %v29_v10 = vld [vmem:[%s184_s1 + $0x28] sm:$0xff]  ;;  %v28_v11 = vld [vmem:[%s184_s1 + $0x20] sm:$0xff] }
   0x5   :  { %v27_v12 = vld [vmem:[%s184_s1 + $0x18] sm:$0xff]  ;;  %v26_v13 = vld [vmem:[%s184_s1 + $0x10] sm:$0xff]  ;;  %v25_v14 = vld [vmem:[%s184_s1 + $0x8] sm:$0xff] }
   0x6   :  { %42 = vmatpush.msra.mxu0 %v37_v2  ;;  %86 = vmatpush.msra.mxu1 %v37_v2  ;;  %v24_v15 = vld [vmem:[%s184_s1] sm:$0xff]  ;;  %v23_v17 = vld [vmem:[%s186_s0 + $0x8] sm:$0xff] }
   0x7   :  { %v22_v16 = vld [vmem:[%s186_s0] sm:$0xff] }
   0x8   :  { %43 = vmatpush.msra.mxu0 %v36_v3  ;;  %87 = vmatpush.msra.mxu1 %v36_v3  ;;  %v100_v18 = vld [vmem:[%s185_s2] ss:$0 sm:$0xff] }
   0xa   :  { %44 = vmatpush.msra.mxu0 %v35_v4  ;;  %88 = vmatpush.msra.mxu1 %v35_v4 }
   0xc   :  { %45 = vmatpush.msra.mxu0 %v34_v5  ;;  %89 = vmatpush.msra.mxu1 %v34_v5 }
   0xe   :  { %46 = vmatpush.msra.mxu0 %v33_v6  ;;  %90 = vmatpush.msra.mxu1 %v33_v6 }
  0x10   :  { %47 = vmatpush.msra.mxu0 %v32_v7  ;;  %91 = vmatpush.msra.mxu1 %v32_v7 }
  0x12   :  { %48 = vmatpush.msra.mxu0 %v31_v8  ;;  %92 = vmatpush.msra.mxu1 %v31_v8 }
  0x14   :  { %49 = vmatpush.msra.mxu0 %v30_v9  ;;  %93 = vmatpush.msra.mxu1 %v30_v9 }
  0x16   :  { %50 = vmatpush.msra.mxu0 %v29_v10  ;;  %94 = vmatpush.msra.mxu1 %v29_v10 }
  0x18   :  { %51 = vmatpush.msra.mxu0 %v28_v11  ;;  %95 = vmatpush.msra.mxu1 %v28_v11 }
  0x1a   :  { %52 = vmatpush.msra.mxu0 %v27_v12  ;;  %96 = vmatpush.msra.mxu1 %v27_v12 }
  0x1c   :  { %53 = vmatpush.msra.mxu0 %v26_v13  ;;  %97 = vmatpush.msra.mxu1 %v26_v13 }
  0x1e   :  { %54 = vmatpush.msra.mxu0 %v25_v14  ;;  %98 = vmatpush.msra.mxu1 %v25_v14 }
  0x20   :  { %55 = vmatpush.msra.mxu0 %v24_v15  ;;  %99 = vmatpush.msra.mxu1 %v24_v15 }
  0x21   :  { %56 = vmatmul.f32.vlgmr.msra.gmra.mxu0 %v22_v16  ;;  %59 = vmatmul.f32.vlgmr.msra.gmra.mxu1 %v23_v17 }
  0x9e   :  { %v57_v19 = vpop.f32.mrf.mxu0  ;;  %v60_v20 = vpop.f32.mrf.mxu1 }
  0x9f   :  { %v76_v21 = vadd.f32 %v100_v18, %v57_v19  ;;  %v77_v22 = vadd.f32 %v100_v18, %v60_v20 }
  0xa1   :  { %78 = vst [vmem:[%s187_s3] sm:$0xff] %v76_v21 }
  0xa2   :  { %79 = vst [vmem:[%s187_s3 + $0x8] sm:$0xff] %v77_v22 }

</bundles_post_ra>
